<compile_context>
chip_gen: v5e
topology: v5e:2x2
jax: 0.10.0
libtpu: 0.0.40
codegen_flags: <defaults>
</compile_context>

<pallas_src>
import functools

import jax
import jax.numpy as jnp
from jax.experimental import pallas as pl
from jax.experimental.pallas import tpu as pltpu


def _se_block_kernel(x_ref, w1_ref, b1_ref, alpha_ref, w2_ref, b2_ref, o_ref, *, inv_hw):
    # x_ref/o_ref: (TB, C, HW_pad).  w1: (C, mid)  b1: (1, mid)
    # alpha_ref: (1,) in SMEM.       w2: (mid, C)  b2: (1, C)

    # Squeeze: global average pool, f32 accumulation (zero padding, if any, does not
    # perturb the sum; divide by the true HW).
    y = jnp.sum(x_ref[...], axis=-1, dtype=jnp.float32) * inv_hw        # (TB, C)

    # Excitation: Linear -> PReLU (single shared alpha) -> Linear -> Sigmoid.
    h = jnp.dot(y, w1_ref[...], preferred_element_type=jnp.float32) + b1_ref[...]
    alpha = alpha_ref[0]                                                 # SMEM scalar
    h = jnp.where(h > 0, h, alpha * h)
    s = jnp.dot(h, w2_ref[...], preferred_element_type=jnp.float32) + b2_ref[...]
    s = jax.nn.sigmoid(s).astype(o_ref.dtype)                            # (TB, C)

    # Scale: re-read x_ref (vld slots have plenty of slack here) rather than keeping a
    # multi-hundred-KiB value live across the MLP; broadcast gates over the lane axis.
    o_ref[...] = x_ref[...] * s[:, :, None]


def _pick_tb(batch, bytes_per_sample, target_bytes=2 << 20, min_steps=4):
    """Largest divisor of `batch` whose x block stays under `target_bytes`, while
    keeping at least min(min_steps, batch) grid steps (v7x megacore + pipelining)."""
    min_steps_eff = min(min_steps, batch)
    best = 1
    for tb in range(1, batch + 1):
        if batch % tb:
            continue
        if tb * bytes_per_sample > target_bytes:
            continue
        if batch // tb < min_steps_eff:
            continue
        best = tb
    return best


def se_block(x_nchw, w1, b1, alpha, w2, b2):
    """x_nchw: (B, C, H, W).  Linear weights follow the JAX (in, out) convention."""
    B, C, H, W = x_nchw.shape
    HW = H * W
    mid = w1.shape[1]
    itemsize = jnp.dtype(x_nchw.dtype).itemsize

    # Lane-dense spatial axis: pad HW up to a multiple of 128 if needed.
    HW_pad = ((HW + 127) // 128) * 128
    x_flat = x_nchw.reshape(B, C, HW)
    if HW_pad != HW:
        # TODO(synk): for heavily-unaligned HW (e.g. 7x7) a reshape-based lane-dense
        # layout would avoid this extra pad copy / padded HBM traffic.
        x_flat = jnp.pad(x_flat, ((0, 0), (0, 0), (0, HW_pad - HW)))

    # Batch TB samples per grid step so each DMA is ~1-4 MiB.
    bytes_per_sample = C * HW_pad * itemsize
    TB = _pick_tb(B, bytes_per_sample)
    grid = (B // TB,)

    # VMEM budget: double-buffered in+out x blocks + resident params + slack,
    # capped generation-aware (48 MiB on v7x, 96 MiB on v5e/v6e).
    block_bytes = TB * bytes_per_sample
    param_bytes = (w1.size + b1.size + w2.size + b2.size) * 4
    try:
        vmem_cap = int(getattr(pltpu.get_tpu_info(), "vmem_capacity_bytes", 64 << 20))
    except Exception:
        vmem_cap = 64 << 20
    vmem_ceiling = (vmem_cap * 3) // 4
    vmem_needed = 4 * block_bytes + 2 * param_bytes + (2 << 20)
    vmem_limit = int(min(max(vmem_needed, 32 << 20), vmem_ceiling))

    # Advisory cost hint so XLA schedules neighbors around the (mem-bound) call.
    cost = pl.CostEstimate(
        flops=4 * B * C * mid + B * C * HW_pad,
        transcendentals=B * C,
        bytes_accessed=2 * B * C * HW_pad * itemsize + param_bytes,
    )

    kernel = functools.partial(_se_block_kernel, inv_hw=1.0 / HW)

    out_flat = pl.pallas_call(
        kernel,
        out_shape=jax.ShapeDtypeStruct((B, C, HW_pad), x_nchw.dtype),
        grid=grid,
        in_specs=[
            pl.BlockSpec((TB, C, HW_pad), lambda b: (b, 0, 0)),     # x tile (TB samples)
            pl.BlockSpec((C, mid), lambda b: (0, 0)),               # w1 (VMEM resident)
            pl.BlockSpec((1, mid), lambda b: (0, 0)),               # b1 (VMEM resident)
            pl.BlockSpec(memory_space=pltpu.MemorySpace.SMEM),      # alpha scalar
            pl.BlockSpec((mid, C), lambda b: (0, 0)),               # w2 (VMEM resident)
            pl.BlockSpec((1, C), lambda b: (0, 0)),                 # b2 (VMEM resident)
        ],
        out_specs=pl.BlockSpec((TB, C, HW_pad), lambda b: (b, 0, 0)),
        compiler_params=pltpu.CompilerParams(
            dimension_semantics=("parallel",),
            vmem_limit_bytes=vmem_limit,
        ),
        cost_estimate=cost,
    )(x_flat, w1, b1.reshape(1, -1), alpha.reshape(1), w2, b2.reshape(1, -1))

    if HW_pad != HW:
        out_flat = out_flat[:, :, :HW]
    return out_flat.reshape(B, C, H, W)


def _reference(x, w1, b1, alpha, w2, b2):
    # Pure-JAX reference mirroring the PyTorch forward.
    y = jnp.mean(x, axis=(2, 3))                       # (B, C)
    h = y @ w1 + b1
    h = jnp.where(h > 0, h, alpha * h)
    s = jax.nn.sigmoid(h @ w2 + b2)                    # (B, C)
    return x * s[:, :, None, None]


if __name__ == "__main__":
    # Small shapes consistent with the module: channel must be divisible by reduction.
    B, C, H, W = 2, 32, 16, 16
    reduction = 8
    mid = C // reduction

    key = jax.random.PRNGKey(0)
    kx, k1, kb1, k2, kb2 = jax.random.split(key, 5)

    x = jax.random.normal(kx, (B, C, H, W), dtype=jnp.float32)

    # Deterministic parameter init (shapes from the module's __init__).
    w1 = jax.random.normal(k1, (C, mid), dtype=jnp.float32) * 0.1    # Linear(channel, channel//r)
    b1 = jax.random.normal(kb1, (mid,), dtype=jnp.float32) * 0.1
    alpha = jnp.array(0.25, dtype=jnp.float32)                       # PReLU default init
    w2 = jax.random.normal(k2, (mid, C), dtype=jnp.float32) * 0.1    # Linear(channel//r, channel)
    b2 = jax.random.normal(kb2, (C,), dtype=jnp.float32) * 0.1

    out = se_block(x, w1, b1, alpha, w2, b2)
    out = jax.block_until_ready(out)

    ref = _reference(x, w1, b1, alpha, w2, b2)
    assert out.shape == (B, C, H, W)
    assert jnp.allclose(out, ref, atol=1e-5, rtol=1e-5), "mismatch vs reference"

    print("KERNEL_OK")
</pallas_src>

<mosaic_0001>
module attributes {stable_mosaic.version = 11 : i64} {
  func.func @_se_block_kernel(%arg0: i32, %arg1: memref<1x32x256xf32, #tpu.memory_space<vmem>>, %arg2: memref<32x4xf32, #tpu.memory_space<vmem>>, %arg3: memref<1x4xf32, #tpu.memory_space<vmem>>, %arg4: memref<1xf32, #tpu.memory_space<smem>>, %arg5: memref<4x32xf32, #tpu.memory_space<vmem>>, %arg6: memref<1x32xf32, #tpu.memory_space<vmem>>, %arg7: memref<1x32x256xf32, #tpu.memory_space<vmem>>) attributes {dimension_semantics = [#tpu.dimension_semantics<parallel>], iteration_bounds = array<i64: 2>, scalar_prefetch = 0 : i64, scratch_operands = 0 : i64, tpu.core_type = #tpu.core_type<tc>, window_params = [{transform_indices = @transform_0, window_bounds = array<i64: 1, 32, 256>}, {pipeline_mode = #tpu.pipeline_mode<synchronous>, transform_indices = @transform_1, window_bounds = array<i64: 32, 4>}, {pipeline_mode = #tpu.pipeline_mode<synchronous>, transform_indices = @transform_2, window_bounds = array<i64: 1, 4>}, {transform_indices = @transform_3, window_bounds = array<i64: 1>}, {pipeline_mode = #tpu.pipeline_mode<synchronous>, transform_indices = @transform_4, window_bounds = array<i64: 4, 32>}, {pipeline_mode = #tpu.pipeline_mode<synchronous>, transform_indices = @transform_5, window_bounds = array<i64: 1, 32>}, {transform_indices = @transform_6, window_bounds = array<i64: 1, 32, 256>}]} {
    %c0 = arith.constant 0 : index
    %c0_0 = arith.constant 0 : index
    %c0_1 = arith.constant 0 : index
    %0 = vector.load %arg1[%c0, %c0_0, %c0_1] : memref<1x32x256xf32, #tpu.memory_space<vmem>>, vector<1x32x256xf32>
    %cst = arith.constant dense<0.000000e+00> : vector<1x32xf32>
    %1 = vector.multi_reduction <add>, %0, %cst [2] : vector<1x32x256xf32> to vector<1x32xf32>
    %cst_2 = arith.constant 3.906250e-03 : f32
    %2 = vector.broadcast %cst_2 : f32 to vector<1x32xf32>
    %3 = arith.mulf %1, %2 : vector<1x32xf32>
    %c0_3 = arith.constant 0 : index
    %c0_4 = arith.constant 0 : index
    %4 = vector.load %arg2[%c0_3, %c0_4] : memref<32x4xf32, #tpu.memory_space<vmem>>, vector<32x4xf32>
    %cst_5 = arith.constant dense<0.000000e+00> : vector<1x4xf32>
    %5 = tpu.matmul %3, %4, %cst_5 {dimension_numbers = #tpu.dot_dimension_numbers<[1], [0], [0], [1], [0, 0, 1, 1], [], []>} : vector<1x32xf32>, vector<32x4xf32>, vector<1x4xf32> -> vector<1x4xf32>
    %c0_6 = arith.constant 0 : index
    %c0_7 = arith.constant 0 : index
    %6 = vector.load %arg3[%c0_6, %c0_7] : memref<1x4xf32, #tpu.memory_space<vmem>>, vector<1x4xf32>
    %7 = arith.addf %5, %6 : vector<1x4xf32>
    %c0_8 = arith.constant 0 : index
    %8 = memref.load %arg4[%c0_8] : memref<1xf32, #tpu.memory_space<smem>>
    %cst_9 = arith.constant 0.000000e+00 : f32
    %9 = vector.broadcast %cst_9 : f32 to vector<1x4xf32>
    %10 = arith.cmpf ogt, %7, %9 : vector<1x4xf32>
    %11 = vector.broadcast %8 : f32 to vector<1x4xf32>
    %12 = arith.mulf %11, %7 : vector<1x4xf32>
    %13 = arith.select %10, %7, %12 : vector<1x4xi1>, vector<1x4xf32>
    %c0_10 = arith.constant 0 : index
    %c0_11 = arith.constant 0 : index
    %14 = vector.load %arg5[%c0_10, %c0_11] : memref<4x32xf32, #tpu.memory_space<vmem>>, vector<4x32xf32>
    %cst_12 = arith.constant dense<0.000000e+00> : vector<1x32xf32>
    %15 = tpu.matmul %13, %14, %cst_12 {dimension_numbers = #tpu.dot_dimension_numbers<[1], [0], [0], [1], [0, 0, 1, 1], [], []>} : vector<1x4xf32>, vector<4x32xf32>, vector<1x32xf32> -> vector<1x32xf32>
    %c0_13 = arith.constant 0 : index
    %c0_14 = arith.constant 0 : index
    %16 = vector.load %arg6[%c0_13, %c0_14] : memref<1x32xf32, #tpu.memory_space<vmem>>, vector<1x32xf32>
    %17 = arith.addf %15, %16 : vector<1x32xf32>
    %18 = arith.negf %17 : vector<1x32xf32>
    %19 = math.exp %18 : vector<1x32xf32>
    %cst_15 = arith.constant 1.000000e+00 : f32
    %20 = vector.broadcast %cst_15 : f32 to vector<1x32xf32>
    %21 = arith.addf %20, %19 : vector<1x32xf32>
    %22 = arith.divf %20, %21 : vector<1x32xf32>
    %c0_16 = arith.constant 0 : index
    %c0_17 = arith.constant 0 : index
    %c0_18 = arith.constant 0 : index
    %23 = vector.load %arg1[%c0_16, %c0_17, %c0_18] : memref<1x32x256xf32, #tpu.memory_space<vmem>>, vector<1x32x256xf32>
    %24 = vector.shape_cast %22 : vector<1x32xf32> to vector<1x32x1xf32>
    %25 = vector.broadcast %24 : vector<1x32x1xf32> to vector<1x32x256xf32>
    %26 = arith.mulf %23, %25 : vector<1x32x256xf32>
    %c0_19 = arith.constant 0 : index
    %c0_20 = arith.constant 0 : index
    %c0_21 = arith.constant 0 : index
    %27 = vector.load %arg7[%c0_19, %c0_20, %c0_21] : memref<1x32x256xf32, #tpu.memory_space<vmem>>, vector<1x32x256xf32>
    tpu.vector_store %arg7[%c0_19, %c0_20, %c0_21], %26 {strides = array<i32>} : memref<1x32x256xf32, #tpu.memory_space<vmem>>, vector<1x32x256xf32>,
    return
  }
  func.func @transform_0(%arg0: i32) -> (i32, i32, i32) {
    %c0_i32 = arith.constant 0 : i32
    %c0_i32_0 = arith.constant 0 : i32
    %c0_i32_1 = arith.constant 0 : i32
    return %arg0, %c0_i32, %c0_i32_0 : i32, i32, i32
  }
  func.func @transform_1(%arg0: i32) -> (i32, i32) {
    %c0_i32 = arith.constant 0 : i32
    %c0_i32_0 = arith.constant 0 : i32
    %c0_i32_1 = arith.constant 0 : i32
    return %c0_i32, %c0_i32_0 : i32, i32
  }
  func.func @transform_2(%arg0: i32) -> (i32, i32) {
    %c0_i32 = arith.constant 0 : i32
    %c0_i32_0 = arith.constant 0 : i32
    %c0_i32_1 = arith.constant 0 : i32
    return %c0_i32, %c0_i32_0 : i32, i32
  }
  func.func @transform_3(%arg0: i32) -> i32 {
    %c0_i32 = arith.constant 0 : i32
    %c0_i32_0 = arith.constant 0 : i32
    return %c0_i32 : i32
  }
  func.func @transform_4(%arg0: i32) -> (i32, i32) {
    %c0_i32 = arith.constant 0 : i32
    %c0_i32_0 = arith.constant 0 : i32
    %c0_i32_1 = arith.constant 0 : i32
    return %c0_i32, %c0_i32_0 : i32, i32
  }
  func.func @transform_5(%arg0: i32) -> (i32, i32) {
    %c0_i32 = arith.constant 0 : i32
    %c0_i32_0 = arith.constant 0 : i32
    %c0_i32_1 = arith.constant 0 : i32
    return %c0_i32, %c0_i32_0 : i32, i32
  }
  func.func @transform_6(%arg0: i32) -> (i32, i32, i32) {
    %c0_i32 = arith.constant 0 : i32
    %c0_i32_0 = arith.constant 0 : i32
    %c0_i32_1 = arith.constant 0 : i32
    return %arg0, %c0_i32, %c0_i32_0 : i32, i32, i32
  }
}

</mosaic_0001>

<bundles_post_ra>
// kernel: tpu_custom_call.1
= control target key start
LH: loop header
LB: loop body
LE: loop exit
PB: predicated region body
PF: predicated region fallthrough
CT: control target
= control target key end

     0   :  { %s931_s0 = inlined_call_operand.hbm [shape: f32[2,32,256], index: 0, kind: input, shape index: {}]   ;;  %s932_s1 = inlined_call_operand.vmem [shape: f32[32,4], index: 1, kind: input, shape index: {}]   ;;  %s933_s2 = inlined_call_operand.vmem [shape: f32[1,4], index: 2, kind: input, shape index: {}]   ;;  %s934_s3 = inlined_call_operand.<no memory space> [shape: f32[1], index: 3, kind: input, shape index: {}]   ;;  %s935_s4 = inlined_call_operand.vmem [shape: f32[4,32], index: 4, kind: input, shape index: {}]   ;;  %s936_s5 = inlined_call_operand.vmem [shape: f32[1,32], index: 5, kind: input, shape index: {}]   ;;  %s937_s6 = inlined_call_operand.hbm [shape: f32[2,32,256], index: 6, kind: output, shape index: {}]  }
   0x1   :  { %11 = sst [smem:[#allocation2]] %s934_s3 }
   0x2   :  { %12 = vsyncpa [#allocation4], 0 }
   0x3   :  { %14 = vsyncpa [#allocation4 + $0x1], 0 }
   0x4   :  { %15 = vsyncpa [#allocation5], 0 }
   0x5   :  { %17 = vsyncpa [#allocation5 + $0x1], 0  ;;  %s747_s23 = smov 0   ;;  %s749_s24 = smov 0  }
   0x6   :  { %s751_s25 = smov 0   ;;  %s753_s26 = smov 0  }
   0x7 LB: > { %s768_s3 = sadd.s32 4294967295, %s703_s26   ;;  %s528_s27 = sadd.s32 4294967294, %s703_s26   ;;  %s703_s26 = sphi %s753_s26, %s947_s26   ;;  %s699_s25 = sphi %s751_s25, %s946_s25   ;;  %s695_s24 = sphi %s749_s24, %s945_s24   ;;  %s691_s23 = sphi %s747_s23, %s944_s23  }
   0x8   : > { %s772_s28 = sadd.s32 1, %s703_s26   ;;  %s30_s29 = sadd.s32 1, %s699_s25 }
   0x9   : > { %s27_s30 = ssub.s32 %s703_s26, %s772_s28  ;;  %p37_p0 = scmp.ne.s32.totalorder %s699_s25, %s695_s24 }
   0xa   : > { %p28_p1 = scmp.eq.s32.totalorder %s27_s30, 0  ;;  %p38_p2 = scmp.eq.s32.totalorder %s703_s26, 0 }
   0xb   : > { %p43_p3 = scmp.ne.s32.totalorder %s695_s24, %s691_s23  ;;  %p44_p4 = scmp.eq.s32.totalorder %s768_s3, 0 }
   0xc   : > { %s784_s7 = scalar_select %p28_p1, %s699_s25, %s30_s29  }
   0xd   : > { %p786_p5 = por %p38_p2, %p37_p0  ;;  %p790_p6 = por %p44_p4, %p43_p3 }
   0xe   : > { %p172_p7 = scmp.eq.s32.totalorder %s768_s3, 1  ;;  %p178_p8 = scmp.eq.s32.totalorder %s528_s27, 1 }
   0xf   : > { %p560_p10 = scmp.lt.s32.totalorder %s703_s26, 2  ;;  %s213_s12 = sand.u32 1, %s699_s25  }
  0x10   : > { %p797_p11 = por %p172_p7, %p37_p0  ;;  %p801_p12 = por %p178_p8, %p43_p3 }
  0x11   : > { %s546_s13 = sshll.u32 %s703_s26, 6  ;;  %s531_s14 = sshll.u32 %s213_s12, 6 }
  0x12   : > { %s222_s17 = scalar_lea.hbm %s931_s0, %s546_s13  ;;  %s217_s19 = scalar_lea.vmem [#allocation3], %s531_s14 }
  0x13   : > { %s223_s18 = sshll.u32 %s222_s17, 4  ;;  %s225_s20 = sshll.u32 %s217_s19, 4  ;;  %s224_s18 = int_to_ptr.hbm [resolvable:$true] %s223_s18  ;;  %s226_s20 = int_to_ptr.vmem [resolvable:$true] %s225_s20 }
  0x14   : > { %p812_p13 = pnand %p560_p10, %p786_p5  ;;  %p534_p0 = scmp.ge.s32.totalorder %s703_s26, 1 }
  0x15   : > { %p233_p1 = scmp.lt.s32.totalorder %s703_s26, 3  ;;  %s214_s22 = scalar_lea.sflag [#allocation4], %s213_s12 }
  0x16   : > { %s607_s27 = sshra.s32 %s224_s18, 4  ;;  %p611_p3 = pneg %p812_p13  ;;  %s608_s27 = int_to_ptr.hbm [resolvable:$true] %s607_s27 }
  0x17   : > { %s609_s29 = scalar_lea.hbm %s608_s27, 64  ;;  %s614_s8 = scalar_lea.hbm %s931_s0, 128 }
  0x18   : > { %p610_p2 = scmp.ne.s32.totalorder %s608_s27, %s609_s29  ;;  %p615_p5 = scmp.lt.s32.totalorder %s608_s27, %s931_s0 }
  0x19   : > { %p616_p8 = scmp.lt.s32.totalorder %s614_s8, %s609_s29 }
  0x1a   : > { %p612_p4 = pnand %p611_p3, %p610_p2 }
  0x1b   : > { %p617_p10 = por %p616_p8, %p615_p5 }
  0x1c   : > { %p613_p7 = pneg %p612_p4 }
  0x1e   : > { %p618_p9 = pnand %p617_p10, %p613_p7 }
  0x20   : > { %621 = shalt.err (!%p618_p9)
}
  0x21   : > { %s705_s12 = smov 256   ;;  %s706_s16 = smov 16  }
  0x22   : > { %555 = dma.hbm_to_vmem [thread:$0]  (!%p812_p13), %s224_s18, 1024, %s226_s20, %s214_s22, %s705_s12, %s705_s12, %s706_s16  }
  0x23   : > { %p234_p2 = pnand %p534_p0, %p233_p1 }
  0x24   : > { %s833_s17 = sand.u32 (!%p234_p2), 1, %s695_s24  }
  0x25   : > { %237 = sbr.rel (%p234_p2) target bundleno = 590 (0x24e), region = 44  ;;  %s535_s19 = sshll.u32 (!%p234_p2), %s833_s17, 6 }
  0x26   : > { %s240_s27 = scalar_lea.sflag (!%p234_p2), [#allocation4], %s833_s17  ;;  %s243_s29 = scalar_lea.vmem (!%p234_p2), [#allocation3], %s535_s19 }
  0x2a   : > { %682 = dma.done.wait (%p790_p6), %s240_s27, 1024  }
  0x2b   : > { %684 = vsyncadd (%p790_p6), %s240_s27, 4294966272  ;;  %v843_v0 = vld [vmem:[%s243_s29] sm:$0xff]  ;;  %v845_v1 = vld [vmem:[%s243_s29 + $0x8] sm:$0xff]  ;;  %v306_v16 = vlaneseq  ;;  %vm311_vm0 = vcmask 130112   ;;  %vm315_vm1 = vcmask 195712   ;;  %vm319_vm2 = vcmask 261312  }
  0x2c   : > { %v847_v2 = vld [vmem:[%s243_s29 + $0x20] sm:$0xff]  ;;  %v281_v3 = vadd.f32 %v845_v1, %v843_v0  ;;  %v851_v4 = vld [vmem:[%s243_s29 + $0x28] sm:$0xff]  ;;  %v855_v6 = vld [vmem:[%s243_s29 + $0x10] sm:$0xff]  ;;  %vm321_vm3 = vcmask 261120   ;;  %vm355_vm4 = vcmask 1043456   ;;  %s344_s12 = sld [smem:[#allocation2]] }
  0x2d   : > { %v287_v5 = vadd.f32 %v851_v4, %v847_v2  ;;  %v857_v7 = vld [vmem:[%s243_s29 + $0x18] sm:$0xff]  ;;  %v859_v8 = vld [vmem:[%s243_s29 + $0x30] sm:$0xff]  ;;  %v298_v14 = vld [vmem:[%s932_s1 + $0x8] sm:$0xff]  ;;  %v307_v19 = vand.u32 127, %v306_v16  ;;  %vm351_vm6 = vcmask 31744   ;;  %v400_v43 = vshrl.u32 %v306_v16, 7 }
  0x2e   : > { %282 = vadd.xlane.f32.xlu0 %v281_v3  ;;  %v861_v9 = vld [vmem:[%s243_s29 + $0x38] sm:$0xff]  ;;  %v284_v10 = vadd.f32 %v857_v7, %v855_v6  ;;  %v299_v13 = vld [vmem:[%s932_s1 + $0x10] sm:$0xff]  ;;  %v297_v15 = vld [vmem:[%s932_s1] sm:$0xff]  ;;  %s272_s18 = scalar_lea.vmem [#allocation6], %s535_s19  ;;  %s547_s20 = sshll.u32 %s768_s3, 6 }
  0x2f   : > { %288 = vadd.xlane.f32.xlu1 %v287_v5  ;;  %v290_v11 = vadd.f32 %v861_v9, %v859_v8  ;;  %v300_v12 = vld [vmem:[%s932_s1 + $0x18] sm:$0xff]  ;;  %v309_v21 = vadd.s32 4294967288, %v307_v19  ;;  %v313_v22 = vadd.s32 4294967280, %v307_v19  ;;  %v317_v25 = vadd.s32 4294967272, %v307_v19  ;;  %v349_v36 = vld [vmem:[%s935_s4] sm:$0xf]  ;;  %598 = vset.pattern.permute.xlu2 %v400_v43  ;;  %s451_s30 = scalar_lea.hbm %s937_s6, %s547_s20 }
  0x30   : > { %336 = vmatpush.msra.mxu0 %v300_v12  ;;  %538 = vmatpush.msk.msra.mxu1 %vm355_vm4, %v349_v36  ;;  %v301_v37 = vld [vmem:[%s933_s2] sm:$0x1]  ;;  %v419_v44 = vadd.s32 24, %v400_v43  ;;  %v413_v45 = vadd.s32 16, %v400_v43  ;;  %v407_v63 = vadd.s32 8, %v400_v43  ;;  %s452_s13 = sshll.u32 %s272_s18, 4  ;;  %s453_s13 = int_to_ptr.vmem [resolvable:$true] %s452_s13 }
  0x31   : > { %v350_v46 = vld [vmem:[%s936_s5] sm:$0x1]  ;;  %s454_s8 = sshll.u32 %s451_s30, 4  ;;  %s440_s3 = scalar_lea.sflag [#allocation5], %s833_s17  ;;  %s455_s8 = int_to_ptr.hbm [resolvable:$true] %s454_s8 }
  0x32   : > { %337 = vmatpush.msra.mxu0 %v299_v13  ;;  %v346_v39 = vstv %s344_s12  ;;  %601 = vset.pattern.permute.xlu1 %v419_v44  ;;  %s651_s19 = sshra.s32 %s455_s8, 4  ;;  %s657_s16 = scalar_lea.hbm %s937_s6, 128  ;;  %s652_s19 = int_to_ptr.hbm [resolvable:$true] %s651_s19 }
  0x33   : > { %600 = vset.pattern.permute.xlu0 %v413_v45  ;;  %s653_s14 = scalar_lea.hbm %s652_s19, 64  ;;  %p658_p0 = scmp.lt.s32.totalorder %s652_s19, %s937_s6 }
  0x34   : > { %338 = vmatpush.msra.mxu0 %v298_v14  ;;  %p654_p6 = scmp.ne.s32.totalorder %s652_s19, %s653_s14  ;;  %p659_p1 = scmp.lt.s32.totalorder %s657_s16, %s653_s14 }
  0x36   : > { %285 = vadd.xlane.f32.xlu0 %v284_v10  ;;  %339 = vmatpush.msra.mxu0 %v297_v15  ;;  %p655_p9 = pnand %p654_p6, %p797_p11  ;;  %p660_p3 = por %p659_p1, %p658_p0 }
  0x37   : > { %291 = vadd.xlane.f32.xlu1 %v290_v11 }
  0x38   : > { %p656_p13 = pneg %p655_p9 }
  0x3a   : > { %p661_p4 = pnand %p660_p3, %p656_p13 }
  0xa1   : > { %v283_v17 = vpop.xlane.xlu0 %282 }
  0xa2   : > { %v289_v18 = vpop.xlane.xlu1 %288  ;;  %v293_v20 = vmul.f32 0.00390625, %v283_v17 }
  0xa3   : > { %v295_v23 = vmul.f32 0.00390625, %v289_v18 }
  0xa4   : > { %v308_v29 = vperm.slane %v293_v20, %v307_v19 }
  0xa5   : > { %v314_v31 = vperm.slane %v295_v23, %v313_v22 }
  0xa9   : > { %v286_v24 = vpop.xlane.xlu0 %285 }
  0xaa   : > { %v294_v26 = vmul.f32 0.00390625, %v286_v24  ;;  %v292_v27 = vpop.xlane.xlu1 %291 }
  0xab   : > { %v296_v28 = vmul.f32 0.00390625, %v292_v27 }
  0xac   : > { %v310_v30 = vperm.slane %v294_v26, %v309_v21 }
  0xad   : > { %v318_v32 = vperm.slane %v296_v28, %v317_v25 }
  0xae   : > { %v312_v33 = vsel %vm311_vm0, %v310_v30, %v308_v29 }
  0xaf   : > { %v316_v34 = vsel %vm315_vm1, %v314_v31, %v312_v33 }
  0xb0   : > { %v320_v35 = vsel %vm319_vm2, %v318_v32, %v316_v34 }
  0xb1   : > { %537 = vmatmul.msk.f32.vlgmr.msra.gmra.mxu0 %vm321_vm3, %v320_v35 }
 0x12e   : > { %v341_v38 = vpop.f32.mrf.mxu0 }
 0x12f   : > { %v342_v40 = vadd.f32 %v341_v38, %v301_v37 }
 0x131   : > { %v347_v41 = vmul.f32 %v346_v39, %v342_v40  ;;  %vm345_vm5 = vcmp.gt.f32.partialorder %v342_v40, 0.0 }
 0x133   : > { %v348_v42 = vsel %vm345_vm5, %v342_v40, %v347_v41 }
 0x134   : > { %539 = vmatmul.msk.f32.vlgmr.msra.gmra.mxu1 %vm351_vm6, %v348_v42 }
 0x1b1   : > { %v376_v47 = vpop.f32.mrf.mxu1 }
 0x1b2   : > { %v377_v48 = vadd.f32 %v376_v47, %v350_v46 }
 0x1b4   : > { %v540_v49 = vmul.f32 -1.442695, %v377_v48 }
 0x1b6   : > { %603 = vpow2.f32 %v540_v49 }
 0x1bc   : > { %v604_v50 = vpop.eup %603 }
 0x1bd   : > { %v382_v51 = vadd.f32 1.0, %v604_v50 }
 0x1bf   : > { %605 = vrcp.f32 %v382_v51  ;;  %v394_v55 = vand.u32 2147483648, %v382_v51  ;;  %v392_v57 = vand.u32 2147483647, %v382_v51  ;;  %vm388_vm8 = vweird.f32 %v382_v51 }
 0x1c1   : > { %v395_v59 = vor.u32 1.1754944e-38, %v394_v55  ;;  %vm393_vm10 = vcmp.eq.f32.partialorder %v392_v57, 8.507059e+37 }
 0x1c5   : > { %v606_v52 = vpop.eup %605 }
 0x1c6   : > { %v384_v53 = vmul.f32 %v606_v52, %v382_v51  ;;  %vm389_vm7 = vweird.f32 %v606_v52 }
 0x1c7   : > { %vm390_vm9 = vmor %vm388_vm8, %vm389_vm7 }
 0x1c8   : > { %v385_v54 = vsub.f32 1.0, %v384_v53 }
 0x1ca   : > { %v386_v56 = vmul.f32 %v606_v52, %v385_v54 }
 0x1cc   : > { %v387_v58 = vadd.f32 %v606_v52, %v386_v56 }
 0x1ce   : > { %v391_v60 = vsel %vm390_vm9, %v606_v52, %v387_v58 }
 0x1cf   : > { %v396_v61 = vsel %vm393_vm10, %v395_v59, %v391_v60 }
 0x1d0   : > { %v398_v62 = vperm.slane %v396_v61, 0 }
 0x1d2   : > { %421 = vperm.xlu1 %601, %v398_v62   ;;  %415 = vperm.xlu0 %600, %v398_v62  }
 0x1d3   : > { %403 = vperm.xlu2 %598, %v398_v62  }
 0x1da   : > { %602 = vset.pattern.permute.xlu0 %v419_v44 }
 0x1db   : > { %599 = vset.pattern.permute.xlu2 %v407_v63 }
 0x1e3   : > { %409 = vperm.xlu2 %599, %v398_v62  }
 0x22d   : > { %v404_v3 = vpop.permute.xlu2 %403 }
 0x22e   : > { %v423_v5 = vmul.f32 %v404_v3, %v843_v0  ;;  %v424_v10 = vmul.f32 %v404_v3, %v845_v1 }
 0x230   : > { %431 = vst [vmem:[%s272_s18] sm:$0xff] %v423_v5 }
 0x231   : > { %432 = vst [vmem:[%s272_s18 + $0x8] sm:$0xff] %v424_v10 }
 0x23d   : > { %v410_v11 = vpop.permute.xlu2 %409 }
 0x23e   : > { %v425_v12 = vmul.f32 %v410_v11, %v855_v6  ;;  %v426_v13 = vmul.f32 %v410_v11, %v857_v7 }
 0x240   : > { %433 = vst [vmem:[%s272_s18 + $0x10] sm:$0xff] %v425_v12 }
 0x241   : > { %434 = vst [vmem:[%s272_s18 + $0x18] sm:$0xff] %v426_v13 }
 0x244   : > { %v422_v0 = vpop.permute.xlu1 %421  ;;  %v416_v1 = vpop.permute.xlu0 %415 }
 0x245   : > { %v429_v14 = vmul.f32 %v422_v0, %v859_v8  ;;  %v430_v15 = vmul.f32 %v422_v0, %v861_v9  ;;  %v427_v6 = vmul.f32 %v416_v1, %v847_v2  ;;  %v428_v7 = vmul.f32 %v416_v1, %v851_v4 }
 0x247   : > { %437 = vst [vmem:[%s272_s18 + $0x30] sm:$0xff] %v429_v14 }
 0x248   : > { %438 = vst [vmem:[%s272_s18 + $0x38] sm:$0xff] %v430_v15 }
 0x249   : > { %435 = vst [vmem:[%s272_s18 + $0x20] sm:$0xff] %v427_v6 }
 0x24a   : > { %436 = vst [vmem:[%s272_s18 + $0x28] sm:$0xff] %v428_v7 }
 0x24b   : > { %664 = shalt.err (!%p661_p4)
}
 0x24c   : > { %s707_s17 = smov 256   ;;  %s708_s9 = smov 16  }
 0x24d   : > { %550 = dma.vmem_to_hbm [thread:$0]  (%p797_p11), %s453_s13, 1024, %s455_s8, %s440_s3, %s707_s17, %s707_s17, %s708_s9  }
 0x24e PF: > { %s469_s18 = sand.u32 1, %s691_s23   ;;  %p943_p7 = scmp.ge.s32.totalorder %s703_s26, 2 }
 0x24f   : > { %s470_s20 = scalar_lea.sflag [#allocation5], %s469_s18 }
 0x250   : > { %p557_p5 = pnand %p943_p7, %p801_p12 }
 0x252   : > { %p558_p8 = pneg %p557_p5 }
 0x254   : > { %686 = dma.done.wait (%p558_p8), %s470_s20, 1024  }
 0x255   : > { %688 = vsyncadd (%p558_p8), %s470_s20, 4294966272  ;;  %p20_p10 = scmp.ge.s32.totalorder %s772_s28, 4   ;;  %s944_s23 = smov %s695_s24 }
 0x256   : > { %s945_s24 = smov %s699_s25  ;;  %s946_s25 = smov %s784_s7 }
 0x257   : > { %s947_s26 = smov %s772_s28  ;;  %22 = sbr.rel (!%p20_p10) target bundleno = 7 (0x7), region = 89 }
 0x25c   :  { %476 = vsyncpa [#allocation4], 1 }
 0x25d   :  { %478 = vsyncpa [#allocation4 + $0x1], 1 }
 0x25e   :  { %479 = vsyncpa [#allocation5], 1 }
 0x25f   :  { %481 = vsyncpa [#allocation5 + $0x1], 1 }

</bundles_post_ra>
